<compile_context>
chip_gen: v6e
topology: v6e:2x2x1
jax: 0.10.0
libtpu: 0.0.40
codegen_flags: <defaults>
</compile_context>

<pallas_src>
import numpy as np
import jax
import jax.numpy as jnp
from jax.experimental import pallas as pl
from jax.experimental.pallas import tpu as pltpu

_VMEM_LIMIT_BYTES = 48 * 1024 * 1024  # safe on v5e/v6e (128 MiB) and v7x (64 MiB) physical VMEM


def _row_tile_default():
    # v7x: 64 MiB VMEM/TC -> smaller row tiles; v5e/v6e (128 MiB) -> bigger.
    try:
        vmem = pltpu.get_tpu_info().vmem_capacity_bytes
        return 512 if vmem <= (64 << 20) else 1024
    except Exception:
        return 512


# ----------------------------------------------------------------------------
# Pallas kernel A: features = fc(images); features = MLP(features) + features
# (BatchNorm is folded into mlp layer-1 weights/bias at parameter-prep time.)
# ----------------------------------------------------------------------------
def _fc_mlp_kernel(x_ref, wfc_ref, bfc_ref, w1_ref, b1_ref, w2_ref, b2_ref, o_ref):
    x = x_ref[...].astype(jnp.bfloat16)                                   # bf16 MXU operands
    h0 = jnp.dot(x, wfc_ref[...], preferred_element_type=jnp.float32) + bfc_ref[...]       # fc (f32 acc)
    z = jnp.dot(h0.astype(jnp.bfloat16), w1_ref[...],
                preferred_element_type=jnp.float32) + b1_ref[...]         # mlp layer 1 (BN folded in)
    z = jnp.maximum(z, 0.0)                                               # ReLU (f32 VPU)
    z = jnp.dot(z.astype(jnp.bfloat16), w2_ref[...],
                preferred_element_type=jnp.float32) + b2_ref[...]         # mlp layer 2
    o_ref[...] = z + h0                                                   # residual (f32)


def _fc_mlp(x2d, p, *, row_tile=None):
    N, Din = x2d.shape
    E = p["fc_w_t"].shape[1]
    hid = p["mlp_w1_t"].shape[1]
    if row_tile is None:
        row_tile = _row_tile_default()
    TN = N if N <= row_tile else row_tile                # row_tile is a multiple of 8
    grid = (pl.cdiv(N, TN),)
    const = lambda i: (0, 0)                             # weights/biases stay VMEM-resident
    return pl.pallas_call(
        _fc_mlp_kernel,
        out_shape=jax.ShapeDtypeStruct((N, E), jnp.float32),
        grid=grid,
        in_specs=[
            pl.BlockSpec((TN, Din), lambda i: (i, 0)),   # row-tiled activations (pipelined)
            pl.BlockSpec((Din, E), const),
            pl.BlockSpec((1, E), const),
            pl.BlockSpec((E, hid), const),
            pl.BlockSpec((1, hid), const),
            pl.BlockSpec((hid, E), const),
            pl.BlockSpec((1, E), const),
        ],
        out_specs=pl.BlockSpec((TN, E), lambda i: (i, 0)),
        compiler_params=pltpu.CompilerParams(
            dimension_semantics=("parallel",),           # v7x: shard row tiles across both TCs
            vmem_limit_bytes=_VMEM_LIMIT_BYTES,
        ),
    )(x2d, p["fc_w_t"], p["fc_b_r"], p["mlp_w1_t"], p["mlp_b1_r"], p["mlp_w2_t"], p["mlp_b2_r"])


# ----------------------------------------------------------------------------
# Pallas kernel B: GPO scores -> masked softmax -> weighted pooling -> l2norm
# Lane-dense layout: scores/softmax are (TB, 1, K) with K on lanes; pooling is an MXU einsum.
# ----------------------------------------------------------------------------
def _gpo_kernel(emb_ref, feat_ref, mask_ref, wlin_ref, o_ref):
    # emb:  (TB, K, H) GRU output (fwd+bwd)/2
    # feat: (TB, K, D) descending-sorted, zero-filled features
    # mask: (TB, 1, K) float {0,1}
    # wlin: (1, 1, H)  score-linear weight (no bias)
    emb = emb_ref[...]
    TB, K, H = emb.shape
    wb = jnp.broadcast_to(wlin_ref[...], (TB, 1, H))
    # scores (TB,1,K): lane-dense, computed on MXU
    scores = jnp.einsum("bqh,bkh->bqk", wb, emb, preferred_element_type=jnp.float32)
    valid = mask_ref[...] > 0.5
    scores = jnp.where(valid, scores, -10000.0) * 10.0                    # == scores / 0.1
    m = jnp.max(scores, axis=-1, keepdims=True)
    e = jnp.exp(scores - m)
    denom = jnp.sum(e, axis=-1, keepdims=True)
    w = e * pl.reciprocal(denom, approx=True)                             # softmax over K (lane axis)
    pooled = jnp.einsum("bqk,bkd->bqd", w, feat_ref[...],
                        preferred_element_type=jnp.float32)               # (TB, 1, D) on MXU
    inv = jax.lax.rsqrt(jnp.sum(pooled * pooled, axis=-1, keepdims=True) + 1e-8)
    o_ref[...] = pooled * inv                                             # l2norm(dim=-1)


def _gpo_pool_l2norm(out_emb, sorted_feats, mask_b1k, lin_w, *, batch_tile=8):
    B, K, H = out_emb.shape
    D = sorted_feats.shape[-1]
    TB = B if B <= batch_tile else batch_tile
    grid = (pl.cdiv(B, TB),)
    out = pl.pallas_call(
        _gpo_kernel,
        out_shape=jax.ShapeDtypeStruct((B, 1, D), jnp.float32),
        grid=grid,
        in_specs=[
            pl.BlockSpec((TB, K, H), lambda b: (b, 0, 0)),
            pl.BlockSpec((TB, K, D), lambda b: (b, 0, 0)),
            pl.BlockSpec((TB, 1, K), lambda b: (b, 0, 0)),
            pl.BlockSpec((1, 1, H), lambda b: (0, 0, 0)),
        ],
        out_specs=pl.BlockSpec((TB, 1, D), lambda b: (b, 0, 0)),
        compiler_params=pltpu.CompilerParams(
            dimension_semantics=("parallel",),
            vmem_limit_bytes=_VMEM_LIMIT_BYTES,
        ),
    )(out_emb, sorted_feats, mask_b1k, lin_w)
    return out.reshape(B, D)


# ----------------------------------------------------------------------------
# Plain-JAX glue: positional encodings + bidirectional GRU (packed-sequence semantics)
# ----------------------------------------------------------------------------
def positional_encoding_1d(d_model, length):
    position = jnp.arange(length, dtype=jnp.float32)[:, None]
    div_term = jnp.exp(jnp.arange(0, d_model, 2, dtype=jnp.float32) * -(np.log(10000.0) / d_model))
    pe = jnp.zeros((length, d_model), dtype=jnp.float32)
    pe = pe.at[:, 0::2].set(jnp.sin(position * div_term))
    pe = pe.at[:, 1::2].set(jnp.cos(position * div_term))
    return pe


def gru_direction(x_seq, valid, Wih, Whh, bih, bhh, reverse):
    # x_seq: (B,K,P), valid: (B,K) bool. Mimics pack_padded_sequence: invalid steps do not
    # advance the hidden state and produce zero outputs.
    B, K, _ = x_seq.shape
    H = Whh.shape[1]

    def cell(h, inp):
        x_t, v_t = inp                       # (B,P), (B,1)
        gi = x_t @ Wih.T + bih
        gh = h @ Whh.T + bhh
        i_r, i_z, i_n = jnp.split(gi, 3, axis=-1)
        h_r, h_z, h_n = jnp.split(gh, 3, axis=-1)
        r = jax.nn.sigmoid(i_r + h_r)
        z = jax.nn.sigmoid(i_z + h_z)
        n = jnp.tanh(i_n + r * h_n)
        h_new = (1.0 - z) * n + z * h
        h_new = jnp.where(v_t, h_new, h)
        return h_new, jnp.where(v_t, h_new, 0.0)

    xs = jnp.swapaxes(x_seq, 0, 1)           # (K,B,P)
    vs = jnp.swapaxes(valid, 0, 1)[..., None]
    h0 = jnp.zeros((B, H), dtype=x_seq.dtype)
    _, outs = jax.lax.scan(cell, h0, (xs, vs), reverse=reverse)
    return jnp.swapaxes(outs, 0, 1)          # (B,K,H)


# ----------------------------------------------------------------------------
# Parameters (deterministic, shapes from the module __init__) + kernel-ready prep
# ----------------------------------------------------------------------------
def make_params(key, img_dim, embed_size, d_pe=32, d_hidden=32):
    hid = embed_size // 2
    ks = jax.random.split(key, 12)
    p = {}
    # fc: Xavier-uniform like init_weights()
    r = np.sqrt(6.0) / np.sqrt(img_dim + embed_size)
    p["fc_w"] = jax.random.uniform(ks[0], (embed_size, img_dim), jnp.float32, -r, r)
    p["fc_b"] = jnp.zeros((embed_size,), jnp.float32)
    # MLP(embed, embed//2, embed, 2)
    lim1 = 1.0 / np.sqrt(embed_size)
    p["mlp_w1"] = jax.random.uniform(ks[1], (hid, embed_size), jnp.float32, -lim1, lim1)
    p["mlp_b1"] = jax.random.uniform(ks[2], (hid,), jnp.float32, -lim1, lim1)
    lim2 = 1.0 / np.sqrt(hid)
    p["mlp_w2"] = jax.random.uniform(ks[3], (embed_size, hid), jnp.float32, -lim2, lim2)
    p["mlp_b2"] = jax.random.uniform(ks[4], (embed_size,), jnp.float32, -lim2, lim2)
    # TODO(synk): BatchNorm1d implemented in eval mode with default-initialized running stats.
    p["bn_g"] = jnp.ones((hid,), jnp.float32)
    p["bn_b"] = jnp.zeros((hid,), jnp.float32)
    p["bn_rm"] = jnp.zeros((hid,), jnp.float32)
    p["bn_rv"] = jnp.ones((hid,), jnp.float32)
    # GPO(32, 32): bidirectional GRU(d_pe -> d_hidden) + Linear(d_hidden, 1, bias=False)
    limg = 1.0 / np.sqrt(d_hidden)
    for i, name in enumerate(["fwd", "bwd"]):
        p[f"gru_wih_{name}"] = jax.random.uniform(ks[5 + 3 * i], (3 * d_hidden, d_pe), jnp.float32, -limg, limg)
        p[f"gru_whh_{name}"] = jax.random.uniform(ks[6 + 3 * i], (3 * d_hidden, d_hidden), jnp.float32, -limg, limg)
        p[f"gru_bih_{name}"] = jax.random.uniform(ks[7 + 3 * i], (3 * d_hidden,), jnp.float32, -limg, limg)
        p[f"gru_bhh_{name}"] = jnp.zeros((3 * d_hidden,), jnp.float32)
    p["gpo_lin_w"] = jax.random.uniform(ks[11], (1, d_hidden), jnp.float32, -limg, limg)
    return p


def prepare_params(raw, eps=1e-5):
    """One-time prep: fold eval-mode BN into mlp layer 1, pre-transpose weights, cast MXU operands
    to bf16, pre-broadcast biases. Done once, outside the per-forward path."""
    p = dict(raw)
    scale = raw["bn_g"] * jax.lax.rsqrt(raw["bn_rv"] + eps)
    w1_f = raw["mlp_w1"] * scale[:, None]                       # (hid, E)
    b1_f = (raw["mlp_b1"] - raw["bn_rm"]) * scale + raw["bn_b"]
    p["fc_w_t"] = raw["fc_w"].T.astype(jnp.bfloat16)            # (Din, E)
    p["fc_b_r"] = raw["fc_b"][None, :].astype(jnp.float32)
    p["mlp_w1_t"] = w1_f.T.astype(jnp.bfloat16)                 # (E, hid)
    p["mlp_b1_r"] = b1_f[None, :].astype(jnp.float32)
    p["mlp_w2_t"] = raw["mlp_w2"].T.astype(jnp.bfloat16)        # (hid, E)
    p["mlp_b2_r"] = raw["mlp_b2"][None, :].astype(jnp.float32)
    p["gpo_lin_w_r"] = raw["gpo_lin_w"].reshape(1, 1, -1).astype(jnp.float32)  # (1,1,H)
    return p


# ----------------------------------------------------------------------------
# Full forward pass (fully jittable: static K, no host sync)
# ----------------------------------------------------------------------------
def image_encoder_forward(images, image_lengths, p, d_pe=32):
    B, K, Din = images.shape
    E = p["fc_w_t"].shape[1]

    # fc + MLP + residual (Pallas kernel A)
    feats2d = _fc_mlp(images.reshape(B * K, Din), p)
    features = feats2d.reshape(B, K, E)

    # ---- GPO pooling (static K; padding handled by mask, no data-dependent max_len) ----
    lengths = image_lengths.astype(jnp.int32)
    pos = jnp.arange(K, dtype=jnp.int32)
    valid = pos[None, :] < lengths[:, None]                 # (B, K)
    pe = positional_encoding_1d(d_pe, K)
    pes = jnp.where(valid[..., None], pe[None], 0.0)        # (B, K, d_pe)

    # TODO(synk): bidirectional GRU recurrence is inherently sequential; run in plain JAX lax.scan.
    out_f = gru_direction(pes, valid, p["gru_wih_fwd"], p["gru_whh_fwd"],
                          p["gru_bih_fwd"], p["gru_bhh_fwd"], reverse=False)
    out_b = gru_direction(pes, valid, p["gru_wih_bwd"], p["gru_whh_bwd"],
                          p["gru_bih_bwd"], p["gru_bhh_bwd"], reverse=True)
    out_emb = 0.5 * (out_f + out_b)                         # (B, K, d_hidden)

    mask3 = valid[..., None]
    # TODO(synk): per-column descending sort along the sequence axis has no clean Pallas TPU equivalent.
    masked = jnp.where(mask3, features, -10000.0)
    sorted_feats = jnp.flip(jnp.sort(masked, axis=1), axis=1)
    sorted_feats = jnp.where(mask3, sorted_feats, 0.0)      # masked_fill(mask==0, 0) after sort

    # scores + masked softmax(/0.1) + weighted pooling + l2norm (Pallas kernel B)
    return _gpo_pool_l2norm(out_emb, sorted_feats, valid.astype(jnp.float32)[:, None, :],
                            p["gpo_lin_w_r"])


if __name__ == "__main__":
    B, K, IMG_DIM, EMBED = 2, 8, 16, 32
    key = jax.random.PRNGKey(0)
    k_img, k_par = jax.random.split(key)

    images = jax.random.normal(k_img, (B, K, IMG_DIM), jnp.float32)
    image_lengths = jnp.array([K, 5], dtype=jnp.int32)
    params = prepare_params(make_params(k_par, IMG_DIM, EMBED))

    fwd = jax.jit(image_encoder_forward)
    out = jax.block_until_ready(fwd(images, image_lengths, params))

    assert out.shape == (B, EMBED)
    assert bool(jnp.all(jnp.isfinite(out)))
    norms = jnp.sqrt(jnp.sum(out * out, axis=-1))
    assert bool(jnp.all(jnp.abs(norms - 1.0) < 1e-3))   # l2norm output should be unit-norm
    print("KERNEL_OK")
</pallas_src>

<mosaic_0001>
module attributes {stable_mosaic.version = 11 : i64} {
  func.func @_fc_mlp_kernel(%arg0: i32, %arg1: memref<16x16xf32, #tpu.memory_space<vmem>>, %arg2: memref<16x32xbf16, #tpu.memory_space<vmem>>, %arg3: memref<1x32xf32, #tpu.memory_space<vmem>>, %arg4: memref<32x16xbf16, #tpu.memory_space<vmem>>, %arg5: memref<1x16xf32, #tpu.memory_space<vmem>>, %arg6: memref<16x32xbf16, #tpu.memory_space<vmem>>, %arg7: memref<1x32xf32, #tpu.memory_space<vmem>>, %arg8: memref<16x32xf32, #tpu.memory_space<vmem>>) attributes {dimension_semantics = [#tpu.dimension_semantics<parallel>], iteration_bounds = array<i64: 1>, scalar_prefetch = 0 : i64, scratch_operands = 0 : i64, tpu.core_type = #tpu.core_type<tc>, window_params = [{transform_indices = @transform_0, window_bounds = array<i64: 16, 16>}, {pipeline_mode = #tpu.pipeline_mode<synchronous>, transform_indices = @transform_1, window_bounds = array<i64: 16, 32>}, {pipeline_mode = #tpu.pipeline_mode<synchronous>, transform_indices = @transform_2, window_bounds = array<i64: 1, 32>}, {pipeline_mode = #tpu.pipeline_mode<synchronous>, transform_indices = @transform_3, window_bounds = array<i64: 32, 16>}, {pipeline_mode = #tpu.pipeline_mode<synchronous>, transform_indices = @transform_4, window_bounds = array<i64: 1, 16>}, {pipeline_mode = #tpu.pipeline_mode<synchronous>, transform_indices = @transform_5, window_bounds = array<i64: 16, 32>}, {pipeline_mode = #tpu.pipeline_mode<synchronous>, transform_indices = @transform_6, window_bounds = array<i64: 1, 32>}, {transform_indices = @transform_7, window_bounds = array<i64: 16, 32>}]} {
    %c0 = arith.constant 0 : index
    %c0_0 = arith.constant 0 : index
    %0 = vector.load %arg1[%c0, %c0_0] : memref<16x16xf32, #tpu.memory_space<vmem>>, vector<16x16xf32>
    %1 = arith.truncf %0 : vector<16x16xf32> to vector<16x16xbf16>
    %c0_1 = arith.constant 0 : index
    %c0_2 = arith.constant 0 : index
    %2 = vector.load %arg2[%c0_1, %c0_2] : memref<16x32xbf16, #tpu.memory_space<vmem>>, vector<16x32xbf16>
    %cst = arith.constant dense<0.000000e+00> : vector<16x32xf32>
    %3 = tpu.matmul %1, %2, %cst {dimension_numbers = #tpu.dot_dimension_numbers<[1], [0], [0], [1], [0, 0, 1, 1], [], []>} : vector<16x16xbf16>, vector<16x32xbf16>, vector<16x32xf32> -> vector<16x32xf32>
    %c0_3 = arith.constant 0 : index
    %c0_4 = arith.constant 0 : index
    %4 = vector.load %arg3[%c0_3, %c0_4] : memref<1x32xf32, #tpu.memory_space<vmem>>, vector<1x32xf32>
    %5 = vector.broadcast %4 : vector<1x32xf32> to vector<16x32xf32>
    %6 = arith.addf %3, %5 : vector<16x32xf32>
    %7 = arith.truncf %6 : vector<16x32xf32> to vector<16x32xbf16>
    %c0_5 = arith.constant 0 : index
    %c0_6 = arith.constant 0 : index
    %8 = vector.load %arg4[%c0_5, %c0_6] : memref<32x16xbf16, #tpu.memory_space<vmem>>, vector<32x16xbf16>
    %cst_7 = arith.constant dense<0.000000e+00> : vector<16x16xf32>
    %9 = tpu.matmul %7, %8, %cst_7 {dimension_numbers = #tpu.dot_dimension_numbers<[1], [0], [0], [1], [0, 0, 1, 1], [], []>} : vector<16x32xbf16>, vector<32x16xbf16>, vector<16x16xf32> -> vector<16x16xf32>
    %c0_8 = arith.constant 0 : index
    %c0_9 = arith.constant 0 : index
    %10 = vector.load %arg5[%c0_8, %c0_9] : memref<1x16xf32, #tpu.memory_space<vmem>>, vector<1x16xf32>
    %11 = vector.broadcast %10 : vector<1x16xf32> to vector<16x16xf32>
    %12 = arith.addf %9, %11 : vector<16x16xf32>
    %cst_10 = arith.constant 0.000000e+00 : f32
    %13 = vector.broadcast %cst_10 : f32 to vector<16x16xf32>
    %14 = arith.maximumf %12, %13 : vector<16x16xf32>
    %15 = arith.truncf %14 : vector<16x16xf32> to vector<16x16xbf16>
    %c0_11 = arith.constant 0 : index
    %c0_12 = arith.constant 0 : index
    %16 = vector.load %arg6[%c0_11, %c0_12] : memref<16x32xbf16, #tpu.memory_space<vmem>>, vector<16x32xbf16>
    %cst_13 = arith.constant dense<0.000000e+00> : vector<16x32xf32>
    %17 = tpu.matmul %15, %16, %cst_13 {dimension_numbers = #tpu.dot_dimension_numbers<[1], [0], [0], [1], [0, 0, 1, 1], [], []>} : vector<16x16xbf16>, vector<16x32xbf16>, vector<16x32xf32> -> vector<16x32xf32>
    %c0_14 = arith.constant 0 : index
    %c0_15 = arith.constant 0 : index
    %18 = vector.load %arg7[%c0_14, %c0_15] : memref<1x32xf32, #tpu.memory_space<vmem>>, vector<1x32xf32>
    %19 = vector.broadcast %18 : vector<1x32xf32> to vector<16x32xf32>
    %20 = arith.addf %17, %19 : vector<16x32xf32>
    %21 = arith.addf %20, %6 : vector<16x32xf32>
    %c0_16 = arith.constant 0 : index
    %c0_17 = arith.constant 0 : index
    %22 = vector.load %arg8[%c0_16, %c0_17] : memref<16x32xf32, #tpu.memory_space<vmem>>, vector<16x32xf32>
    tpu.vector_store %arg8[%c0_16, %c0_17], %21 {strides = array<i32>} : memref<16x32xf32, #tpu.memory_space<vmem>>, vector<16x32xf32>,
    return
  }
  func.func @transform_0(%arg0: i32) -> (i32, i32) {
    %c0_i32 = arith.constant 0 : i32
    %c0_i32_0 = arith.constant 0 : i32
    return %arg0, %c0_i32 : i32, i32
  }
  func.func @transform_1(%arg0: i32) -> (i32, i32) {
    %c0_i32 = arith.constant 0 : i32
    %c0_i32_0 = arith.constant 0 : i32
    %c0_i32_1 = arith.constant 0 : i32
    return %c0_i32, %c0_i32_0 : i32, i32
  }
  func.func @transform_2(%arg0: i32) -> (i32, i32) {
    %c0_i32 = arith.constant 0 : i32
    %c0_i32_0 = arith.constant 0 : i32
    %c0_i32_1 = arith.constant 0 : i32
    return %c0_i32, %c0_i32_0 : i32, i32
  }
  func.func @transform_3(%arg0: i32) -> (i32, i32) {
    %c0_i32 = arith.constant 0 : i32
    %c0_i32_0 = arith.constant 0 : i32
    %c0_i32_1 = arith.constant 0 : i32
    return %c0_i32, %c0_i32_0 : i32, i32
  }
  func.func @transform_4(%arg0: i32) -> (i32, i32) {
    %c0_i32 = arith.constant 0 : i32
    %c0_i32_0 = arith.constant 0 : i32
    %c0_i32_1 = arith.constant 0 : i32
    return %c0_i32, %c0_i32_0 : i32, i32
  }
  func.func @transform_5(%arg0: i32) -> (i32, i32) {
    %c0_i32 = arith.constant 0 : i32
    %c0_i32_0 = arith.constant 0 : i32
    %c0_i32_1 = arith.constant 0 : i32
    return %c0_i32, %c0_i32_0 : i32, i32
  }
  func.func @transform_6(%arg0: i32) -> (i32, i32) {
    %c0_i32 = arith.constant 0 : i32
    %c0_i32_0 = arith.constant 0 : i32
    %c0_i32_1 = arith.constant 0 : i32
    return %c0_i32, %c0_i32_0 : i32, i32
  }
  func.func @transform_7(%arg0: i32) -> (i32, i32) {
    %c0_i32 = arith.constant 0 : i32
    %c0_i32_0 = arith.constant 0 : i32
    return %arg0, %c0_i32 : i32, i32
  }
}

module attributes {stable_mosaic.version = 11 : i64} {
  func.func @_gpo_kernel(%arg0: i32, %arg1: memref<2x8x32xf32, #tpu.memory_space<vmem>>, %arg2: memref<2x8x32xf32, #tpu.memory_space<vmem>>, %arg3: memref<2x1x8xf32, #tpu.memory_space<vmem>>, %arg4: memref<1x1x32xf32, #tpu.memory_space<vmem>>, %arg5: memref<2x1x32xf32, #tpu.memory_space<vmem>>) attributes {dimension_semantics = [#tpu.dimension_semantics<parallel>], iteration_bounds = array<i64: 1>, scalar_prefetch = 0 : i64, scratch_operands = 0 : i64, tpu.core_type = #tpu.core_type<tc>, window_params = [{transform_indices = @transform_0, window_bounds = array<i64: 2, 8, 32>}, {transform_indices = @transform_1, window_bounds = array<i64: 2, 8, 32>}, {transform_indices = @transform_2, window_bounds = array<i64: 2, 1, 8>}, {pipeline_mode = #tpu.pipeline_mode<synchronous>, transform_indices = @transform_3, window_bounds = array<i64: 1, 1, 32>}, {transform_indices = @transform_4, window_bounds = array<i64: 2, 1, 32>}]} {
    %c0 = arith.constant 0 : index
    %c0_0 = arith.constant 0 : index
    %c0_1 = arith.constant 0 : index
    %0 = vector.load %arg1[%c0, %c0_0, %c0_1] : memref<2x8x32xf32, #tpu.memory_space<vmem>>, vector<2x8x32xf32>
    %c0_2 = arith.constant 0 : index
    %c0_3 = arith.constant 0 : index
    %c0_4 = arith.constant 0 : index
    %1 = vector.load %arg4[%c0_2, %c0_3, %c0_4] : memref<1x1x32xf32, #tpu.memory_space<vmem>>, vector<1x1x32xf32>
    %2 = vector.shape_cast %1 : vector<1x1x32xf32> to vector<1x1x32xf32>
    %3 = vector.broadcast %2 : vector<1x1x32xf32> to vector<2x1x32xf32>
    "tpu.trace_start"() <{level = 10 : i32, message = "bqh,bkh->bqk"}> : () -> ()
    %cst = arith.constant dense<0.000000e+00> : vector<2x1x8xf32>
    %4 = tpu.matmul %3, %0, %cst {dimension_numbers = #tpu.dot_dimension_numbers<[2], [2], [1], [1], [0, 0, 0, 1, 1, 1], [0], [0]>} : vector<2x1x32xf32>, vector<2x8x32xf32>, vector<2x1x8xf32> -> vector<2x1x8xf32>
    "tpu.trace_stop"() : () -> ()
    %c0_5 = arith.constant 0 : index
    %c0_6 = arith.constant 0 : index
    %c0_7 = arith.constant 0 : index
    %5 = vector.load %arg3[%c0_5, %c0_6, %c0_7] : memref<2x1x8xf32, #tpu.memory_space<vmem>>, vector<2x1x8xf32>
    %cst_8 = arith.constant 5.000000e-01 : f32
    %6 = vector.broadcast %cst_8 : f32 to vector<2x1x8xf32>
    %7 = arith.cmpf ogt, %5, %6 : vector<2x1x8xf32>
    %cst_9 = arith.constant -1.000000e+04 : f32
    %8 = vector.broadcast %cst_9 : f32 to vector<2x1x8xf32>
    %9 = arith.select %7, %4, %8 : vector<2x1x8xi1>, vector<2x1x8xf32>
    %cst_10 = arith.constant 1.000000e+01 : f32
    %10 = vector.broadcast %cst_10 : f32 to vector<2x1x8xf32>
    %11 = arith.mulf %9, %10 : vector<2x1x8xf32>
    %cst_11 = arith.constant dense<0xFF800000> : vector<2x1xf32>
    %12 = vector.multi_reduction <maximumf>, %11, %cst_11 [2] : vector<2x1x8xf32> to vector<2x1xf32>
    %13 = vector.shape_cast %12 : vector<2x1xf32> to vector<2x1x1xf32>
    %14 = vector.broadcast %13 : vector<2x1x1xf32> to vector<2x1x8xf32>
    %15 = arith.subf %11, %14 : vector<2x1x8xf32>
    %16 = math.exp %15 : vector<2x1x8xf32>
    %cst_12 = arith.constant dense<0.000000e+00> : vector<2x1xf32>
    %17 = vector.multi_reduction <add>, %16, %cst_12 [2] : vector<2x1x8xf32> to vector<2x1xf32>
    %18 = vector.shape_cast %17 : vector<2x1xf32> to vector<2x1x1xf32>
    %19 = tpu.reciprocal %18 {approx = true} : vector<2x1x1xf32> -> vector<2x1x1xf32>
    %20 = vector.broadcast %19 : vector<2x1x1xf32> to vector<2x1x8xf32>
    %21 = arith.mulf %16, %20 : vector<2x1x8xf32>
    %c0_13 = arith.constant 0 : index
    %c0_14 = arith.constant 0 : index
    %c0_15 = arith.constant 0 : index
    %22 = vector.load %arg2[%c0_13, %c0_14, %c0_15] : memref<2x8x32xf32, #tpu.memory_space<vmem>>, vector<2x8x32xf32>
    "tpu.trace_start"() <{level = 10 : i32, message = "bqk,bkd->bqd"}> : () -> ()
    %cst_16 = arith.constant dense<0.000000e+00> : vector<2x1x32xf32>
    %23 = tpu.matmul %21, %22, %cst_16 {dimension_numbers = #tpu.dot_dimension_numbers<[2], [1], [1], [2], [0, 0, 0, 1, 1, 2], [0], [0]>} : vector<2x1x8xf32>, vector<2x8x32xf32>, vector<2x1x32xf32> -> vector<2x1x32xf32>
    "tpu.trace_stop"() : () -> ()
    %24 = arith.mulf %23, %23 : vector<2x1x32xf32>
    %cst_17 = arith.constant dense<0.000000e+00> : vector<2x1xf32>
    %25 = vector.multi_reduction <add>, %24, %cst_17 [2] : vector<2x1x32xf32> to vector<2x1xf32>
    %26 = vector.shape_cast %25 : vector<2x1xf32> to vector<2x1x1xf32>
    %cst_18 = arith.constant 9.99999993E-9 : f32
    %27 = vector.broadcast %cst_18 : f32 to vector<2x1x1xf32>
    %28 = arith.addf %26, %27 : vector<2x1x1xf32>
    %29 = math.rsqrt %28 : vector<2x1x1xf32>
    %30 = vector.broadcast %29 : vector<2x1x1xf32> to vector<2x1x32xf32>
    %31 = arith.mulf %23, %30 : vector<2x1x32xf32>
    %c0_19 = arith.constant 0 : index
    %c0_20 = arith.constant 0 : index
    %c0_21 = arith.constant 0 : index
    %32 = vector.load %arg5[%c0_19, %c0_20, %c0_21] : memref<2x1x32xf32, #tpu.memory_space<vmem>>, vector<2x1x32xf32>
    tpu.vector_store %arg5[%c0_19, %c0_20, %c0_21], %31 {strides = array<i32>} : memref<2x1x32xf32, #tpu.memory_space<vmem>>, vector<2x1x32xf32>,
    return
  }
  func.func @transform_0(%arg0: i32) -> (i32, i32, i32) {
    %c0_i32 = arith.constant 0 : i32
    %c0_i32_0 = arith.constant 0 : i32
    %c0_i32_1 = arith.constant 0 : i32
    return %arg0, %c0_i32, %c0_i32_0 : i32, i32, i32
  }
  func.func @transform_1(%arg0: i32) -> (i32, i32, i32) {
    %c0_i32 = arith.constant 0 : i32
    %c0_i32_0 = arith.constant 0 : i32
    %c0_i32_1 = arith.constant 0 : i32
    return %arg0, %c0_i32, %c0_i32_0 : i32, i32, i32
  }
  func.func @transform_2(%arg0: i32) -> (i32, i32, i32) {
    %c0_i32 = arith.constant 0 : i32
    %c0_i32_0 = arith.constant 0 : i32
    %c0_i32_1 = arith.constant 0 : i32
    return %arg0, %c0_i32, %c0_i32_0 : i32, i32, i32
  }
  func.func @transform_3(%arg0: i32) -> (i32, i32, i32) {
    %c0_i32 = arith.constant 0 : i32
    %c0_i32_0 = arith.constant 0 : i32
    %c0_i32_1 = arith.constant 0 : i32
    %c0_i32_2 = arith.constant 0 : i32
    return %c0_i32, %c0_i32_0, %c0_i32_1 : i32, i32, i32
  }
  func.func @transform_4(%arg0: i32) -> (i32, i32, i32) {
    %c0_i32 = arith.constant 0 : i32
    %c0_i32_0 = arith.constant 0 : i32
    %c0_i32_1 = arith.constant 0 : i32
    return %arg0, %c0_i32, %c0_i32_0 : i32, i32, i32
  }
}

</mosaic_0001>

<bundles_post_ra>
// kernel: custom-call.1
= control target key start
LH: loop header
LB: loop body
LE: loop exit
PB: predicated region body
PF: predicated region fallthrough
CT: control target
= control target key end

     0   :  { %s6_s0 = inlined_call_operand.vmem [shape: f32[2,32], index: 0, kind: output, shape index: {}]  }

// kernel: image_encoder_forward.2
= control target key start
LH: loop header
LB: loop body
LE: loop exit
PB: predicated region body
PF: predicated region fallthrough
CT: control target
= control target key end

     0   :  { %v272_v0 = vmov 0.0   ;;  %vm273_vm0 = vmmov 0   ;;  %vm45_vm1 = vcmask 130048   ;;  %vm114_vm2 = vcmask 261120   ;;  %s352_s1 = inlined_call_operand.vmem [shape: bf16[16,32], index: 1, kind: input, shape index: {}]   ;;  %s353_s0 = inlined_call_operand.vmem [shape: f32[16,16], index: 0, kind: input, shape index: {}]   ;;  %s354_s3 = inlined_call_operand.vmem [shape: bf16[32,16], index: 3, kind: input, shape index: {}]   ;;  %s355_s2 = inlined_call_operand.vmem [shape: f32[1,32], index: 2, kind: input, shape index: {}]   ;;  %s356_s5 = inlined_call_operand.vmem [shape: bf16[16,32], index: 5, kind: input, shape index: {}]   ;;  %s357_s4 = inlined_call_operand.vmem [shape: f32[1,16], index: 4, kind: input, shape index: {}]   ;;  %s358_s6 = inlined_call_operand.vmem [shape: f32[1,32], index: 6, kind: input, shape index: {}]   ;;  %s359_s7 = inlined_call_operand.vmem [shape: f32[16,32], index: 7, kind: output, shape index: {}]  }
   0x1   :  { %246 = vmatprep.subr.bf16.mxu0 %v272_v0  ;;  %v268_v1 = vld [vmem:[%s352_s1] sm:$0xff]   ;;  %248 = vmatprep.mubr.msk.bf16.mxu0 %vm273_vm0, %v272_v0  ;;  %v28_v3 = vld [vmem:[%s353_s0 + $0x8] sm:$0xff] }
   0x2   :  { %v27_v2 = vld [vmem:[%s353_s0] sm:$0xff]  ;;  %252 = vmatprep.subr.bf16.mxu1 %v272_v0  ;;  %256 = vmatprep.mubr.msk.bf16.mxu1 %vm273_vm0, %v272_v0  ;;  %v269_v5 = vld [vmem:[%s354_s3 + $0x8] sm:$0xff]  }
   0x3   :  { %247 = vmatpush3.bf16.msra.mxu0 %v268_v1  ;;  %v29_v4 = vpack.c.bf16 %v28_v3, %v27_v2  ;;  %253 = vmatpush3.bf16.msra.mxu1 %v269_v5  ;;  %v270_v6 = vld [vmem:[%s354_s3] sm:$0xff]  }
   0x4   :  { %260 = vmatprep.subr.bf16.mxu0 %v272_v0  ;;  %254 = vmatprep.subr.bf16.mxu1 %v272_v0  ;;  %v229_v8 = vld [vmem:[%s355_s2] ss:$0 sm:$0xff] }
   0x5   :  { %v271_v15 = vld [vmem:[%s356_s5] sm:$0xff]  }
   0x6   :  { %249 = vmatmul.mubr.msk.bf16.vlgmr.msra.gmra.mxu0 %vm45_vm1, %v29_v4  ;;  %v232_v16 = vld [vmem:[%s357_s4] ss:$0 sm:$0xff] }
   0x7   :  { %262 = vmatprep.mubr.msk.bf16.mxu0 %vm273_vm0, %v272_v0  ;;  %255 = vmatpush3.bf16.msra.mxu1 %v270_v6  ;;  %v236_v26 = vld [vmem:[%s358_s6] ss:$0 sm:$0xff] }
   0x8   :  { %261 = vmatpush3.bf16.msra.mxu0 %v271_v15 }
  0xc6   :  { %v83_v7 = vpop.f32.mrf.mxu0 }
  0xc7   :  { %v84_v11 = vadd.f32 %v229_v8, %v83_v7 }
  0xc8   :  { %v250_v9 = vpop.f32.mrf.mxu0 }
  0xca   :  { %v86_v10 = vpop.f32.mrf.mxu0 }
  0xcb   :  { %v87_v12 = vadd.f32 %v229_v8, %v86_v10 }
  0xcc   :  { %v251_v13 = vpop.f32.mrf.mxu0 }
  0xcd   :  { %v90_v14 = vpack.c.bf16 %v87_v12, %v84_v11 }
  0xcf   :  { %257 = vmatmul.mubr.msk.bf16.vlgmr.msra.gmra.mxu1 %vm114_vm2, %v90_v14 }
 0x18f   :  { %v152_v17 = vpop.f32.mrf.mxu1 }
 0x190   :  { %v153_v19 = vadd.f32 %v232_v16, %v152_v17 }
 0x191   :  { %v258_v18 = vpop.f32.mrf.mxu1 }
 0x192   :  { %v159_v23 = vmax.f32 %v153_v19, 0.0 }
 0x193   :  { %v155_v20 = vpop.f32.mrf.mxu1 }
 0x194   :  { %v156_v21 = vadd.f32 %v232_v16, %v155_v20 }
 0x195   :  { %v259_v22 = vpop.f32.mrf.mxu1 }
 0x196   :  { %v160_v24 = vmax.f32 %v156_v21, 0.0 }
 0x198   :  { %v161_v25 = vpack.c.bf16 %v160_v24, %v159_v23 }
 0x19a   :  { %263 = vmatmul.mubr.msk.bf16.vlgmr.msra.gmra.mxu0 %vm45_vm1, %v161_v25 }
 0x25a   :  { %v214_v27 = vpop.f32.mrf.mxu0 }
 0x25b   :  { %v215_v28 = vadd.f32 %v236_v26, %v214_v27 }
 0x25c   :  { %v264_v29 = vpop.f32.mrf.mxu0 }
 0x25d   :  { %v221_v30 = vadd.f32 %v215_v28, %v84_v11 }
 0x25e   :  { %v217_v31 = vpop.f32.mrf.mxu0 }
 0x25f   :  { %223 = vst.msk [vmem:[%s359_s7] sm:$0xff] %vm114_vm2, %v221_v30  ;;  %v218_v32 = vadd.f32 %v236_v26, %v217_v31 }
 0x260   :  { %v265_v33 = vpop.f32.mrf.mxu0 }
 0x261   :  { %v222_v34 = vadd.f32 %v218_v32, %v87_v12 }
 0x263   :  { %224 = vst.msk [vmem:[%s359_s7 + $0x8] sm:$0xff] %vm114_vm2, %v222_v34 }

// kernel: image_encoder_forward.3
= control target key start
LH: loop header
LB: loop body
LE: loop exit
PB: predicated region body
PF: predicated region fallthrough
CT: control target
= control target key end

     0   :  { %vm21_vm0 = vcmask 261120   ;;  %v457_v2 = vmov 0.0   ;;  %s519_s0 = inlined_call_operand.vmem [shape: f32[2,8,32], index: 0, kind: input, shape index: {}]   ;;  %s520_s1 = inlined_call_operand.vmem [shape: f32[2,8,32], index: 1, kind: input, shape index: {}]   ;;  %s521_s2 = inlined_call_operand.vmem [shape: f32[2,1,8], index: 2, kind: input, shape index: {}]   ;;  %s522_s3 = inlined_call_operand.vmem [shape: f32[1,1,32], index: 3, kind: input, shape index: {}]   ;;  %s523_s4 = inlined_call_operand.hbm [shape: f32[2,1,32], index: 4, kind: output, shape index: {}]  }
   0x1   :  { %v18_v0 = vld [vmem:[%s519_s0] sm:$0xff]  ;;  %v19_v1 = vld [vmem:[%s519_s0 + $0x8] sm:$0xff]  ;;  %398 = vmatprep.subr.mxu0 %v457_v2  ;;  %403 = vmatprep.subr.mxu1 %v457_v2 }
   0x2   :  { %9 = vsyncpa [#allocation3], 0  ;;  %399 = vmatpush3.xpose.msk.msra.mxu0 %vm21_vm0, %v18_v0  ;;  %vm458_vm1 = vmmov 0   ;;  %v20_v3 = vld [vmem:[%s522_s3] sm:$0x1]  ;;  %404 = vmatpush3.xpose.msk.msra.mxu1 %vm21_vm0, %v19_v1  ;;  %vm179_vm4 = vcmask 57344  }
   0x3   :  { %400 = vmatprep.mubr.msk.f32.mxu0 %vm458_vm1, %v457_v2  ;;  %405 = vmatprep.mubr.msk.f32.mxu1 %vm458_vm1, %v457_v2  ;;  %v171_v4 = vld [vmem:[%s521_s2] sm:$0x1]  ;;  %v172_v5 = vld [vmem:[%s521_s2 + $0x1] sm:$0x1]  ;;  %v203_v27 = vld [vmem:[%s520_s1 + $0x8] sm:$0xff]  ;;  %vm204_vm5 = vcmask 64512  }
   0x4   :  { %408 = vmatprep.subr.mxu0 %v457_v2  ;;  %413 = vmatprep.subr.mxu1 %v457_v2  ;;  %vm173_vm2 = vcmp.gt.f32.partialorder %v171_v4, 0.5  ;;  %vm174_vm3 = vcmp.gt.f32.partialorder %v172_v5, 0.5  ;;  %v202_v26 = vld [vmem:[%s520_s1] sm:$0xff]  ;;  %vm353_vm6 = vcmask 253952   ;;  %s459_s1 = smov [#allocation2]  }
   0x5   :  { %401 = vmatmul.mubr.msk.f32.vlgmr.msra.gmra.mxu0 %vm21_vm0, %v20_v3  ;;  %406 = vmatmul.mubr.msk.f32.vlgmr.msra.gmra.mxu1 %vm21_vm0, %v20_v3  ;;  %s373_s26 = sshll.u32 %s459_s1, 4  ;;  %s374_s26 = int_to_ptr.vmem [resolvable:$true] %s373_s26 }
   0x6   :  { %410 = vmatprep.mubr.msk.f32.mxu0 %vm458_vm1, %v457_v2  ;;  %415 = vmatprep.mubr.msk.f32.mxu1 %vm458_vm1, %v457_v2  ;;  %s435_s27 = scalar_lea.vmem %s374_s26, 32  ;;  %p440_p1 = scmp.lt.s32.totalorder %s374_s26, %s374_s26 }
   0x7   :  { %409 = vmatpush3.msra.mxu0 %v202_v26  ;;  %414 = vmatpush3.msra.mxu1 %v203_v27  ;;  %p436_p0 = scmp.ne.s32.totalorder %s374_s26, %s435_s27  ;;  %p441_p2 = scmp.lt.s32.totalorder %s435_s27, %s435_s27 }
   0x9   :  { %p442_p3 = por %p441_p2, %p440_p1 }
   0xb   :  { %p443_p4 = pnand %p442_p3, %p436_p0 }
  0xc5   :  { %v94_v6 = vpop.f32.mrf.mxu0  ;;  %v167_v8 = vpop.f32.mrf.mxu1 }
  0xc6   :  { %v175_v7 = vsel %vm173_vm2, %v94_v6, -10000.0  ;;  %v176_v11 = vsel %vm174_vm3, %v167_v8, -10000.0 }
  0xc7   :  { %v177_v9 = vmul.f32 10.0, %v175_v7  ;;  %v402_v10 = vpop.f32.mrf.mxu0  ;;  %v178_v12 = vmul.f32 10.0, %v176_v11  ;;  %v407_v13 = vpop.f32.mrf.mxu1 }
  0xc9   :  { %v180_v14 = vsel %vm179_vm4, %v177_v9, -inf  ;;  %v183_v15 = vsel %vm179_vm4, %v178_v12, -inf }
  0xca   :  { %181 = vmax.xlane.f32.xlu0 %v180_v14 }
  0xce   :  { %184 = vmax.xlane.f32.xlu0 %v183_v15 }
 0x153   :  { %v182_v16 = vpop.xlane.xlu0 %181 }
 0x154   :  { %v186_v17 = vsub.f32 %v177_v9, %v182_v16 }
 0x156   :  { %v188_v18 = vmul.f32 1.442695, %v186_v17 }
 0x157   :  { %v185_v19 = vpop.xlane.xlu0 %184 }
 0x158   :  { %423 = vpow2.f32 %v188_v18  ;;  %v187_v20 = vsub.f32 %v178_v12, %v185_v19 }
 0x15a   :  { %v190_v21 = vmul.f32 1.442695, %v187_v20 }
 0x15c   :  { %425 = vpow2.f32 %v190_v21 }
 0x165   :  { %v424_v22 = vpop.eup %423 }
 0x166   :  { %v192_v23 = vsel %vm179_vm4, %v424_v22, 0.0 }
 0x167   :  { %193 = vadd.xlane.f32.xlu1 %v192_v23 }
 0x169   :  { %v426_v24 = vpop.eup %425 }
 0x16a   :  { %v195_v25 = vsel %vm179_vm4, %v426_v24, 0.0 }
 0x16b   :  { %196 = vadd.xlane.f32.xlu1 %v195_v25 }
 0x1f0   :  { %v194_v28 = vpop.xlane.xlu1 %193 }
 0x1f1   :  { %427 = vrcp.f32 %v194_v28 }
 0x1f4   :  { %v197_v29 = vpop.xlane.xlu1 %196 }
 0x1f5   :  { %429 = vrcp.f32 %v197_v29 }
 0x1fe   :  { %v428_v30 = vpop.eup %427 }
 0x1ff   :  { %v200_v31 = vmul.f32 %v428_v30, %v424_v22 }
 0x201   :  { %411 = vmatmul.mubr.msk.f32.vlgmr.msra.gmra.mxu0 %vm204_vm5, %v200_v31 }
 0x202   :  { %v430_v32 = vpop.eup %429 }
 0x203   :  { %v201_v33 = vmul.f32 %v430_v32, %v426_v24 }
 0x205   :  { %416 = vmatmul.mubr.msk.f32.vlgmr.msra.gmra.mxu1 %vm204_vm5, %v201_v33 }
 0x2c1   :  { %v274_v34 = vpop.f32.mrf.mxu0 }
 0x2c2   :  { %v351_v35 = vmul.f32 %v274_v34, %v274_v34 }
 0x2c3   :  { %v412_v36 = vpop.f32.mrf.mxu0 }
 0x2c4   :  { %v354_v37 = vsel %vm353_vm6, %v351_v35, 0.0 }
 0x2c5   :  { %v347_v38 = vpop.f32.mrf.mxu1  ;;  %355 = vadd.xlane.f32.xlu0 %v354_v37 }
 0x2c6   :  { %v352_v39 = vmul.f32 %v347_v38, %v347_v38 }
 0x2c7   :  { %v417_v40 = vpop.f32.mrf.mxu1 }
 0x2c8   :  { %v357_v41 = vsel %vm353_vm6, %v352_v39, 0.0 }
 0x2c9   :  { %358 = vadd.xlane.f32.xlu1 %v357_v41 }
 0x34e   :  { %v356_v42 = vpop.xlane.xlu0 %355 }
 0x34f   :  { %v360_v43 = vadd.f32 1e-08, %v356_v42 }
 0x351   :  { %431 = vrsqrt.f32 %v360_v43 }
 0x352   :  { %v359_v44 = vpop.xlane.xlu1 %358 }
 0x353   :  { %v361_v45 = vadd.f32 1e-08, %v359_v44 }
 0x355   :  { %433 = vrsqrt.f32 %v361_v45 }
 0x35e   :  { %v432_v46 = vpop.eup %431 }
 0x35f   :  { %v364_v47 = vmul.f32 %v432_v46, %v274_v34 }
 0x361   :  { %366 = vst.msk [vmem:[#allocation2] sm:$0x1] %vm353_vm6, %v364_v47 }
 0x362   :  { %v434_v48 = vpop.eup %433 }
 0x363   :  { %v365_v49 = vmul.f32 %v434_v48, %v347_v38 }
 0x365   :  { %367 = vst.msk [vmem:[#allocation2 + $0x1] sm:$0x1] %vm353_vm6, %v365_v49 }
 0x366   :  { %446 = shalt.err (!%p443_p4)
}
 0x367   :  { %s460_s28 = smov 16   ;;  %s461_s29 = smov 1  }
 0x368   :  { %379 = dma.vmem_to_hbm [thread:$0]  %s374_s26, 32, %s523_s4, [#allocation3], %s460_s28, %s460_s28, %s461_s29  }
 0x369   :  { %455 = dma.done.wait [#allocation3], 32  }
 0x36a   :  { %456 = vsyncadd [#allocation3], 4294967264 }
 0x36b   :  { %383 = vsyncpa [#allocation3], 1 }

</bundles_post_ra>
